<compile_context>
chip_gen: v7x
topology: tpu7x:2x2x1
jax: 0.10.0
libtpu: 0.0.40
codegen_flags: <defaults>
</compile_context>

<pallas_src>
import jax
import jax.numpy as jnp
from jax.experimental import pallas as pl
from jax.experimental.pallas import tpu as pltpu


def _ffn_kernel(x_ref, w1_ref, b1_ref, w2_ref, b2_ref, o_ref):
    # x_ref : (C, TN)   activations, spatial on the lane axis
    # w1_ref: (Hd, C)   bf16, BN scale folded in
    # b1_ref: (Hd, 1)   f32
    # w2_ref: (C, Hd)   bf16, BN scale folded in
    # b2_ref: (C, 1)    f32
    # o_ref : (C, TN)
    x = x_ref[...].astype(jnp.bfloat16)

    # fc1: 1x1 conv (channel matmul, scale pre-folded) + bias + ReLU
    h = jnp.dot(w1_ref[...], x, preferred_element_type=jnp.float32)
    h = jnp.maximum(h + b1_ref[...], 0.0)

    # fc2: 1x1 conv + bias
    y = jnp.dot(w2_ref[...], h.astype(jnp.bfloat16),
                preferred_element_type=jnp.float32)
    y = y + b2_ref[...]

    o_ref[...] = y.astype(o_ref.dtype)


def _pick_spatial_tile(hw, target):
    """Largest multiple-of-128 divisor of hw that is <= target, or hw itself
    when hw <= target.  Falls back to padding only for ragged sizes."""
    if hw <= target:
        return hw, 0
    t = (min(target, hw) // 128) * 128
    while t >= 128:
        if hw % t == 0:
            return t, 0
        t -= 128
    pad = (-hw) % target          # rare: ragged spatial extent
    return target, pad


def ffn_forward(x_nchw, params, *, spatial_tile=2048):
    """x_nchw: (B, C, H, W).  Returns (B, C, H, W) in the input dtype."""
    w1_conv, s1, b1, w2_conv, s2, b2 = params
    B, C, H, W = x_nchw.shape
    Hd = w1_conv.shape[0]
    assert w1_conv.shape == (Hd, C) and w2_conv.shape == (C, Hd)

    # Fold BN scales into the conv weights (once, at trace time) and cast the
    # weights to bf16 so the MXU runs at native rate; biases stay f32.
    w1f = (w1_conv * s1[:, None]).astype(jnp.bfloat16)   # (Hd, C)
    w2f = (w2_conv * s2[:, None]).astype(jnp.bfloat16)   # (C, Hd)
    b1c = b1.reshape(Hd, 1).astype(jnp.float32)
    b2c = b2.reshape(C, 1).astype(jnp.float32)

    # NCHW -> (B, C, H*W) is a pure view: no transpose, no HBM copy.
    hw = H * W
    x3 = x_nchw.reshape(B, C, hw)
    tile_n, pad = _pick_spatial_tile(hw, spatial_tile)
    if pad:
        x3 = jnp.pad(x3, ((0, 0), (0, 0), (0, pad)))
    hwp = hw + pad
    grid = (B, hwp // tile_n)

    out3 = pl.pallas_call(
        _ffn_kernel,
        out_shape=jax.ShapeDtypeStruct((B, C, hwp), x_nchw.dtype),
        grid_spec=pltpu.PrefetchScalarGridSpec(
            num_scalar_prefetch=0,
            grid=grid,
            in_specs=[
                # activations: batch squeezed, channels on sublanes,
                # lane-dense spatial tile on lanes
                pl.BlockSpec((pl.Squeezed(), C, tile_n),
                             lambda b, n: (b, 0, n)),
                pl.BlockSpec((Hd, C), lambda b, n: (0, 0)),   # W1 (folded)
                pl.BlockSpec((Hd, 1), lambda b, n: (0, 0)),   # b1
                pl.BlockSpec((C, Hd), lambda b, n: (0, 0)),   # W2 (folded)
                pl.BlockSpec((C, 1), lambda b, n: (0, 0)),    # b2
            ],
            out_specs=pl.BlockSpec((pl.Squeezed(), C, tile_n),
                                   lambda b, n: (b, 0, n)),
        ),
        compiler_params=pltpu.CompilerParams(
            dimension_semantics=("parallel", "parallel"),
            vmem_limit_bytes=48 * 1024 * 1024,  # safe on v7x (64 MiB phys)
        ),
    )(x3, w1f, b1c, w2f, b2c)

    if pad:
        out3 = out3[:, :, :hw]
    return out3.reshape(B, C, H, W)


def make_ffn_params(key, embed_dim, hidden_dim, dtype=jnp.float32, eps=1e-5):
    """Deterministic synthetic parameters mirroring Conv2dBN (eval mode).

    fc1 conv weight: (hidden, embed) ;  fc2 conv weight: (embed, hidden)
    BN is represented by per-channel scale s and shift b.
    """
    k1, k2, k3, k4, k5, k6 = jax.random.split(key, 6)

    w1_conv = jax.random.normal(k1, (hidden_dim, embed_dim), dtype) * 0.1
    g1 = jnp.ones((hidden_dim,), dtype)              # bn.weight init = 1
    beta1 = jnp.zeros((hidden_dim,), dtype)          # bn.bias init = 0
    mean1 = jax.random.normal(k2, (hidden_dim,), dtype) * 0.05
    var1 = jax.random.uniform(k3, (hidden_dim,), dtype, 0.5, 1.5)
    s1 = g1 / jnp.sqrt(var1 + eps)
    b1 = beta1 - mean1 * s1

    w2_conv = jax.random.normal(k4, (embed_dim, hidden_dim), dtype) * 0.1
    g2 = jnp.ones((embed_dim,), dtype)
    beta2 = jnp.zeros((embed_dim,), dtype)
    mean2 = jax.random.normal(k5, (embed_dim,), dtype) * 0.05
    var2 = jax.random.uniform(k6, (embed_dim,), dtype, 0.5, 1.5)
    s2 = g2 / jnp.sqrt(var2 + eps)
    b2 = beta2 - mean2 * s2

    return (w1_conv, s1, b1, w2_conv, s2, b2)


def ffn_reference(x_nchw, params):
    """Pure-JAX f32 reference of the same computation."""
    w1_conv, s1, b1, w2_conv, s2, b2 = params
    B, C, H, W = x_nchw.shape
    xf = x_nchw.reshape(B, C, H * W).astype(jnp.float32)
    h = jnp.einsum('oc,bcn->bon', w1_conv * s1[:, None], xf) + b1[:, None]
    h = jnp.maximum(h, 0.0)
    y = jnp.einsum('co,bon->bcn', w2_conv * s2[:, None], h) + b2[:, None]
    return y.reshape(B, C, H, W).astype(x_nchw.dtype)


if __name__ == "__main__":
    key = jax.random.PRNGKey(0)
    kx, kp = jax.random.split(key)

    B, C, H, W = 2, 4, 16, 16           # embed_dim = 4
    hidden_dim = 8                       # typical hidden = 2 * embed
    x = jax.random.normal(kx, (B, C, H, W), jnp.float32)

    params = make_ffn_params(kp, embed_dim=C, hidden_dim=hidden_dim)

    out = ffn_forward(x, params)
    out = jax.block_until_ready(out)

    ref = ffn_reference(x, params)
    assert out.shape == (B, C, H, W)
    # bf16 matmul operands with f32 accumulation -> loosen tolerance vs f32 ref
    assert jnp.allclose(out, ref, atol=1e-2, rtol=1e-2), (
        float(jnp.max(jnp.abs(out - ref))))

    print("KERNEL_OK")
</pallas_src>

<mosaic_0001>
module attributes {stable_mosaic.version = 11 : i64} {
  func.func @_ffn_kernel(%arg0: i32, %arg1: i32, %arg2: memref<1x4x256xf32, #tpu.memory_space<vmem>>, %arg3: memref<8x4xbf16, #tpu.memory_space<vmem>>, %arg4: memref<8x1xf32, #tpu.memory_space<vmem>>, %arg5: memref<4x8xbf16, #tpu.memory_space<vmem>>, %arg6: memref<4x1xf32, #tpu.memory_space<vmem>>, %arg7: memref<1x4x256xf32, #tpu.memory_space<vmem>>) attributes {dimension_semantics = [#tpu.dimension_semantics<parallel>, #tpu.dimension_semantics<parallel>], iteration_bounds = array<i64: 2, 1>, scalar_prefetch = 0 : i64, scratch_operands = 0 : i64, tpu.core_type = #tpu.core_type<tc>, window_params = [{transform_indices = @transform_0, window_bounds = array<i64: 1, 4, 256>}, {pipeline_mode = #tpu.pipeline_mode<synchronous>, transform_indices = @transform_1, window_bounds = array<i64: 8, 4>}, {pipeline_mode = #tpu.pipeline_mode<synchronous>, transform_indices = @transform_2, window_bounds = array<i64: 8, 1>}, {pipeline_mode = #tpu.pipeline_mode<synchronous>, transform_indices = @transform_3, window_bounds = array<i64: 4, 8>}, {pipeline_mode = #tpu.pipeline_mode<synchronous>, transform_indices = @transform_4, window_bounds = array<i64: 4, 1>}, {transform_indices = @transform_5, window_bounds = array<i64: 1, 4, 256>}]} {
    %c0 = arith.constant 0 : index
    %c0_0 = arith.constant 0 : index
    %c0_1 = arith.constant 0 : index
    %0 = vector.load %arg2[%c0, %c0_0, %c0_1] : memref<1x4x256xf32, #tpu.memory_space<vmem>>, vector<1x4x256xf32>
    %1 = vector.shape_cast %0 : vector<1x4x256xf32> to vector<4x256xf32>
    %2 = arith.truncf %1 : vector<4x256xf32> to vector<4x256xbf16>
    %c0_2 = arith.constant 0 : index
    %c0_3 = arith.constant 0 : index
    %3 = vector.load %arg3[%c0_2, %c0_3] : memref<8x4xbf16, #tpu.memory_space<vmem>>, vector<8x4xbf16>
    %cst = arith.constant dense<0.000000e+00> : vector<8x256xf32>
    %4 = tpu.matmul %3, %2, %cst {dimension_numbers = #tpu.dot_dimension_numbers<[1], [0], [0], [1], [0, 0, 1, 1], [], []>} : vector<8x4xbf16>, vector<4x256xbf16>, vector<8x256xf32> -> vector<8x256xf32>
    %c0_4 = arith.constant 0 : index
    %c0_5 = arith.constant 0 : index
    %5 = vector.load %arg4[%c0_4, %c0_5] : memref<8x1xf32, #tpu.memory_space<vmem>>, vector<8x1xf32>
    %6 = vector.broadcast %5 : vector<8x1xf32> to vector<8x256xf32>
    %7 = arith.addf %4, %6 : vector<8x256xf32>
    %cst_6 = arith.constant 0.000000e+00 : f32
    %8 = vector.broadcast %cst_6 : f32 to vector<8x256xf32>
    %9 = arith.maximumf %7, %8 : vector<8x256xf32>
    %c0_7 = arith.constant 0 : index
    %c0_8 = arith.constant 0 : index
    %10 = vector.load %arg5[%c0_7, %c0_8] : memref<4x8xbf16, #tpu.memory_space<vmem>>, vector<4x8xbf16>
    %11 = arith.truncf %9 : vector<8x256xf32> to vector<8x256xbf16>
    %cst_9 = arith.constant dense<0.000000e+00> : vector<4x256xf32>
    %12 = tpu.matmul %10, %11, %cst_9 {dimension_numbers = #tpu.dot_dimension_numbers<[1], [0], [0], [1], [0, 0, 1, 1], [], []>} : vector<4x8xbf16>, vector<8x256xbf16>, vector<4x256xf32> -> vector<4x256xf32>
    %c0_10 = arith.constant 0 : index
    %c0_11 = arith.constant 0 : index
    %13 = vector.load %arg6[%c0_10, %c0_11] : memref<4x1xf32, #tpu.memory_space<vmem>>, vector<4x1xf32>
    %14 = vector.broadcast %13 : vector<4x1xf32> to vector<4x256xf32>
    %15 = arith.addf %12, %14 : vector<4x256xf32>
    %c0_12 = arith.constant 0 : index
    %c0_13 = arith.constant 0 : index
    %c0_14 = arith.constant 0 : index
    %16 = vector.load %arg7[%c0_12, %c0_13, %c0_14] : memref<1x4x256xf32, #tpu.memory_space<vmem>>, vector<1x4x256xf32>
    %17 = vector.shape_cast %16 : vector<1x4x256xf32> to vector<4x256xf32>
    %18 = vector.shape_cast %15 : vector<4x256xf32> to vector<1x4x256xf32>
    tpu.vector_store %arg7[%c0_12, %c0_13, %c0_14], %18 {strides = array<i32>} : memref<1x4x256xf32, #tpu.memory_space<vmem>>, vector<1x4x256xf32>,
    return
  }
  func.func @transform_0(%arg0: i32, %arg1: i32) -> (i32, i32, i32) {
    %c0_i32 = arith.constant 0 : i32
    %c0_i32_0 = arith.constant 0 : i32
    return %arg0, %c0_i32, %arg1 : i32, i32, i32
  }
  func.func @transform_1(%arg0: i32, %arg1: i32) -> (i32, i32) {
    %c0_i32 = arith.constant 0 : i32
    %c0_i32_0 = arith.constant 0 : i32
    %c0_i32_1 = arith.constant 0 : i32
    return %c0_i32, %c0_i32_0 : i32, i32
  }
  func.func @transform_2(%arg0: i32, %arg1: i32) -> (i32, i32) {
    %c0_i32 = arith.constant 0 : i32
    %c0_i32_0 = arith.constant 0 : i32
    %c0_i32_1 = arith.constant 0 : i32
    return %c0_i32, %c0_i32_0 : i32, i32
  }
  func.func @transform_3(%arg0: i32, %arg1: i32) -> (i32, i32) {
    %c0_i32 = arith.constant 0 : i32
    %c0_i32_0 = arith.constant 0 : i32
    %c0_i32_1 = arith.constant 0 : i32
    return %c0_i32, %c0_i32_0 : i32, i32
  }
  func.func @transform_4(%arg0: i32, %arg1: i32) -> (i32, i32) {
    %c0_i32 = arith.constant 0 : i32
    %c0_i32_0 = arith.constant 0 : i32
    %c0_i32_1 = arith.constant 0 : i32
    return %c0_i32, %c0_i32_0 : i32, i32
  }
  func.func @transform_5(%arg0: i32, %arg1: i32) -> (i32, i32, i32) {
    %c0_i32 = arith.constant 0 : i32
    %c0_i32_0 = arith.constant 0 : i32
    return %arg0, %c0_i32, %arg1 : i32, i32, i32
  }
}

</mosaic_0001>

<bundles_post_ra>
// kernel: tpu_custom_call.1
= control target key start
LH: loop header
LB: loop body
LE: loop exit
PB: predicated region body
PF: predicated region fallthrough
CT: control target
= control target key end

     0   :  { %10 = vsyncpa [#allocation3], 0  ;;  %s794_s0 = inlined_call_operand.vmem [shape: f32[2,4,256], index: 0, kind: input, shape index: {}]   ;;  %s795_s1 = inlined_call_operand.vmem [shape: bf16[8,4], index: 1, kind: input, shape index: {}]   ;;  %s796_s2 = inlined_call_operand.vmem [shape: f32[8,1], index: 2, kind: input, shape index: {}]   ;;  %s797_s3 = inlined_call_operand.vmem [shape: bf16[4,8], index: 3, kind: input, shape index: {}]   ;;  %s798_s4 = inlined_call_operand.vmem [shape: f32[4,1], index: 4, kind: input, shape index: {}]   ;;  %s799_s5 = inlined_call_operand.hbm [shape: f32[2,4,256], index: 5, kind: output, shape index: {}]  }
   0x1   :  { %12 = vsyncpa [#allocation3 + $0x1], 0  ;;  %s670_s18 = smov 0   ;;  %s672_s19 = smov 0  }
   0x2   :  { %s674_s20 = smov 0   ;;  %s676_s21 = smov 0  }
   0x3   :  { %s678_s22 = smov 0   ;;  %s680_s23 = smov 0  }
   0x4 LB: > { %s481_s24 = sadd.s32 4294967295, %s636_s23   ;;  %s482_s25 = sadd.s32 4294967294, %s636_s23   ;;  %s636_s23 = sphi %s680_s23, %s18_s23   ;;  %s632_s22 = sphi %s678_s22, %s806_s22   ;;  %s628_s21 = sphi %s676_s21, %s805_s21   ;;  %s624_s20 = sphi %s674_s20, %s804_s20   ;;  %s620_s19 = sphi %s672_s19, %s803_s19   ;;  %s616_s18 = sphi %s670_s18, %s802_s18  }
   0x5   : > { %s30_s26 = sadd.s32 1, %s632_s22  ;;  %s151_s27 = sadd.s32 1, %s624_s20 }
   0x6   : > { %p32_p0 = scmp.ge.s32.totalorder %s30_s26, 2  ;;  %p161_p1 = scmp.ne.s32.totalorder %s624_s20, %s620_s19 }
   0x7   : > { %p162_p2 = scmp.eq.s32.totalorder %s481_s24, 1  ;;  %p167_p3 = scmp.ne.s32.totalorder %s620_s19, %s616_s18 }
   0x8   : > { %s808_s26 = smov (%p32_p0, %s30_s26), 0  ;;  %p168_p5 = scmp.eq.s32.totalorder %s482_s25, 1 }
   0x9   : > { %p710_p4 = por %p162_p2, %p161_p1  ;;  %s146_s29 = ssub.s32 %s632_s22, %s808_s26 }
   0xa   : > { %p485_p6 = scmp.ge.s32.totalorder %s636_s23, 1  ;;  %p149_p7 = scmp.eq.s32.totalorder %s146_s29, 0 }
   0xb   : > { %p717_p8 = por %p168_p5, %p167_p3  ;;  %p211_p9 = scmp.lt.s32.totalorder %s636_s23, 3 }
   0xc   : > { %s723_s6 = scalar_select %p149_p7, %s624_s20, %s151_s27  }
   0xd   : > { %p212_p10 = pnand %p485_p6, %p211_p9 }
   0xe   : > { %p244_p11 = scmp.lt.s32.totalorder (!%p212_p10), %s628_s21, 1  ;;  %v638_v0 = vmov (!%p212_p10), 0   ;;  %v262_v1 = vld [vmem:[%s796_s2] sm:$0xff] (!%p212_p10)  ;;  %vm272_vm0 = vcmask (!%p212_p10), 1041408   ;;  %vm268_vm1 = vcmask (!%p212_p10), 31744   ;;  %vm335_vm2 = vcmask (!%p212_p10), 1043456  }
   0xf   : > { %215 = sbr.rel (%p212_p10) target bundleno = 489 (0x1e9), region = 40  ;;  %311 = vmatprep.mubr.bf16.mxu0 (!%p212_p10), %v638_v0  ;;  %556 = vset.pattern.permute.xlu0 (!%p212_p10), %v638_v0  ;;  %v325_v2 = vld [vmem:[%s798_s4] sm:$0xf] (!%p212_p10)  ;;  %vm331_vm3 = vcmask (!%p212_p10), 64512   ;;  %s240_s27 = sand.u32 (!%p212_p10), 1, %s620_s19  }
  0x10   : > { %265 = vperm.xlu0 (!%p212_p10), %556, %v262_v1   ;;  %374 = vmatprep.mubr.bf16.mxu1 (!%p212_p10), %v638_v0  ;;  %v261_v8 = vld [vmem:[%s795_s1] sm:$0xf] (!%p212_p10)  ;;  %s486_s29 = sshll.u32 (!%p212_p10), %s240_s27, 3  ;;  %s499_s7 = sshll.u32 (!%p212_p10), %s628_s21, 7 }
  0x11   : > { %v322_v21 = vld [vmem:[%s797_s3] sm:$0x3] (!%p212_p10)  ;;  %s242_s8 = scalar_lea.vmem (!%p212_p10), [#allocation2], %s486_s29  ;;  %s389_s13 = scalar_lea.sflag (!%p212_p10), [#allocation3], %s240_s27 }
  0x14   : > { %328 = vperm.xlu0 (!%p212_p10), %556, %v325_v2  }
  0x16   : > { %s245_s9 = scalar_select %p244_p11, %s628_s21, 1 }
  0x17   : > { %s639_s21 = smov [#allocation2]  }
  0x18   : > { %s498_s12 = sshll.u32 %s245_s9, 3  ;;  %s405_s9 = sshll.u32 %s242_s8, 4  ;;  %s749_s9 = int_to_ptr.vmem [resolvable:$true] %s405_s9 }
  0x19   : > { %s251_s15 = scalar_lea.vmem %s794_s0, %s498_s12  ;;  %s747_s12 = scalar_lea.hbm %s799_s5, %s499_s7 }
  0x1a   : > { %v255_v3 = vld [vmem:[%s251_s15] sm:$0xff]  ;;  %s558_s14 = scalar_lea.vmem %s749_s9, 128  ;;  %s562_s15 = sshll.u32 %s639_s21, 4  ;;  %s563_s15 = int_to_ptr.vmem [resolvable:$false] %s562_s15 }
  0x1b   : > { %v257_v4 = vcombine.high %v255_v3, %v255_v3  ;;  %v259_v5 = vpack.c.bf16 %v255_v3, %v255_v3  ;;  %p559_p12 = scmp.ne.s32.totalorder %s749_s9, %s558_s14  ;;  %s564_s16 = scalar_lea.vmem %s563_s15, 256 }
  0x1c   : > { %p565_p1 = scmp.lt.s32.totalorder %s749_s9, %s563_s15  ;;  %p566_p2 = scmp.lt.s32.totalorder %s564_s16, %s558_s14 }
  0x1d   : > { %v260_v6 = vpack.c.bf16 %v257_v4, %v257_v4  ;;  %v274_v7 = vsel %vm272_vm0, %v259_v5, 0  ;;  %p560_p13 = pnand %p559_p12, %p710_p4 }
  0x1e   : > { %p567_p3 = por %p566_p2, %p565_p1 }
  0x1f   : > { %489 = vmatprep.subr.msk.bf16.mxu0 %vm272_vm0, %v260_v6  ;;  %p561_p0 = pneg %p560_p13 }
  0x20   : > { %280 = vmatpush1.bf16.msra.mxu0 %v274_v7 }
  0x21   : > { %p568_p5 = pnand %p567_p3, %p561_p0 }
  0x23   : > { %490 = vmatmul.mubr.msk.bf16.vlgmr.msra.gmra.mrb[0].mxu0 %vm268_vm1, %v261_v8 }
  0x8f   : > { %v266_v9 = vpop.permute.xlu0 %265 }
  0x93   : > { %v329_v22 = vpop.permute.xlu0 %328 }
  0xf6   : > { %v313_v10 = vpop.f32.mrb[0].mxu0 }
  0xf7   : > { %v314_v11 = vadd.f32 %v313_v10, %v266_v9  ;;  %v315_v12 = vpop.f32.mrb[1].mxu0 }
  0xf8   : > { %v316_v13 = vadd.f32 %v315_v12, %v266_v9  ;;  %v317_v14 = vpop.f32.mrb[2].mxu0 }
  0xf9   : > { %v320_v15 = vmax.f32 %v314_v11, 0.0  ;;  %v318_v16 = vpop.f32.mrb[3].mxu0 }
  0xfa   : > { %v321_v17 = vmax.f32 %v316_v13, 0.0 }
  0xfb   : > { %v323_v18 = vpack.c.bf16 %v320_v15, %v320_v15 }
  0xfc   : > { %v324_v19 = vpack.c.bf16 %v321_v17, %v321_v17 }
  0xfd   : > { %v337_v20 = vsel %vm335_vm2, %v323_v18, 0 }
  0xfe   : > { %491 = vmatprep.subr.msk.bf16.mxu1 %vm335_vm2, %v324_v19 }
  0xff   : > { %343 = vmatpush1.bf16.msra.mxu1 %v337_v20 }
 0x102   : > { %492 = vmatmul.mubr.msk.bf16.vlgmr.msra.gmra.mrb[0].mxu1 %vm331_vm3, %v322_v21 }
 0x1d5   : > { %v376_v23 = vpop.f32.mrb[0].mxu1 }
 0x1d6   : > { %v377_v24 = vadd.f32 %v376_v23, %v329_v22  ;;  %v378_v25 = vpop.f32.mrb[1].mxu1 }
 0x1d7   : > { %v379_v26 = vadd.f32 %v378_v25, %v329_v22  ;;  %v380_v27 = vpop.f32.mrb[2].mxu1 }
 0x1d8   : > { %v381_v28 = vpop.f32.mrb[3].mxu1 }
 0x1d9   : > { %v385_v29 = vcombine.low %v377_v24, %v379_v26 }
 0x1db   : > { %387 = vst [vmem:[%s242_s8] sm:$0xff] %v385_v29 }
 0x1dc   : > { %571 = shalt.err (!%p568_p5)
}
 0x1dd   : > { %s572_s17 = scalar_lea.hbm %s747_s12, 128  ;;  %s576_s27 = scalar_lea.hbm %s799_s5, 256 }
 0x1de   : > { %p573_p6 = scmp.ne.s32.totalorder %s747_s12, %s572_s17  ;;  %p577_p10 = scmp.lt.u32.totalorder %s747_s12, %s799_s5 }
 0x1df   : > { %p578_p11 = scmp.lt.u32.totalorder %s576_s27, %s572_s17  ;;  %p580_p13 = scmp.lt.u32.totalorder %s572_s17, %s747_s12 }
 0x1e0   : > { %p574_p7 = pnand %p573_p6, %p710_p4 }
 0x1e1   : > { %p579_p12 = por %p578_p11, %p577_p10 }
 0x1e2   : > { %p575_p9 = pneg %p574_p7 }
 0x1e3   : > { %p581_p0 = por %p580_p13, %p579_p12 }
 0x1e5   : > { %p582_p1 = pnand %p581_p0, %p575_p9 }
 0x1e7   : > { %585 = shalt.err (!%p582_p1)
}
 0x1e8   : > { %500 = dma.vmem_to_hbm [thread:$0]  (%p710_p4), %s749_s9, 128, %s747_s12, %s389_s13  }
 0x1e9 PF: > { %p506_p2 = scmp.ge.s32.totalorder %s636_s23, 2  ;;  %s417_s8 = sand.u32 1, %s616_s18  }
 0x1ea   : > { %s418_s10 = scalar_lea.sflag [#allocation3], %s417_s8 }
 0x1eb   : > { %p503_p3 = pnand %p506_p2, %p717_p8 }
 0x1ed   : > { %611 = dma.done.wait (!%p503_p3), %s418_s10, 128  }
 0x1ee   : > { %613 = vsyncadd (!%p503_p3), %s418_s10, 4294967168  ;;  %s18_s23 = sadd.s32 1, %s636_s23   ;;  %s802_s18 = smov %s620_s19 }
 0x1ef   : > { %p15_p5 = scmp.ge.s32.totalorder %s18_s23, 4   ;;  %s803_s19 = smov %s624_s20 }
 0x1f0   : > { %s804_s20 = smov %s723_s6  ;;  %s805_s21 = smov %s632_s22 }
 0x1f1   : > { %s806_s22 = smov %s808_s26  ;;  %17 = sbr.rel (!%p15_p5) target bundleno = 4 (0x4), region = 75 }
 0x1f8   :  { %423 = vsyncpa [#allocation3], 1 }
 0x1f9   :  { %425 = vsyncpa [#allocation3 + $0x1], 1 }

</bundles_post_ra>
